<compile_context>
chip_gen: v6e
topology: v6e:2x2x1
jax: 0.10.0
libtpu: 0.0.40
codegen_flags: <defaults>
</compile_context>

<pallas_src>
import functools

import jax
import jax.numpy as jnp
from jax.experimental import pallas as pl
from jax.experimental.pallas import tpu as pltpu


def _round_up(a: int, b: int) -> int:
    return (a + b - 1) // b * b


@functools.lru_cache(maxsize=None)
def _roll_matches_jnp() -> bool:
    """One-time tiny probe that pins pltpu.roll's shift direction vs jnp.roll."""
    def probe(x_ref, o_ref):
        o_ref[...] = pltpu.roll(x_ref[...], 1, axis=1)

    x = jnp.tile(jnp.arange(128, dtype=jnp.float32)[None, :], (8, 1))
    out = pl.pallas_call(
        probe, out_shape=jax.ShapeDtypeStruct((8, 128), jnp.float32))(x)
    return bool(jnp.array_equal(out, jnp.roll(x, 1, axis=1)))


def _tv_kernel(mask_h_ref, mask_w_ref, img_ref, out_ref, acc_h_ref, acc_w_ref,
               *, shift_h, shift_w, n_h, n_w, norm):
    i = pl.program_id(0)

    @pl.when(i == 0)
    def _():
        acc_h_ref[...] = jnp.zeros_like(acc_h_ref)
        acc_w_ref[...] = jnp.zeros_like(acc_w_ref)

    x = img_ref[...].astype(jnp.float32)          # (tn, mp), lane-dense
    mh = mask_h_ref[...]                          # (1, mp) in {0, 1}
    mw = mask_w_ref[...]                          # (1, mp) in {0, 1}

    # Forward differences on the flattened (H*W) lane axis: neighbour at +k*W
    # (H direction) / +k (W direction), invalid wrapped/cross-row positions
    # zeroed by the masks. Rolls run on the XLU, masks are cheap VPU muls.
    dh = (pltpu.roll(x, shift_h, axis=1) - x) * mh
    dw = (pltpu.roll(x, shift_w, axis=1) - x) * mw
    sh = dh * dh
    sw = dw * dw

    # Fold the tn rows into the 8-row vreg-aligned accumulators with pure VPU
    # adds (static, sublane-aligned slices); no per-step cross-lane reduce.
    tn = sh.shape[0]
    rows = acc_h_ref.shape[0]                     # 8
    ph = sh[0:rows, :]
    pw = sw[0:rows, :]
    for g in range(1, tn // rows):
        ph = ph + sh[g * rows:(g + 1) * rows, :]
        pw = pw + sw[g * rows:(g + 1) * rows, :]
    acc_h_ref[...] += ph
    acc_w_ref[...] += pw

    @pl.when(i == pl.num_programs(0) - 1)
    def _():
        tv_h = jnp.sum(acc_h_ref[...], keepdims=True) / n_h     # (1, 1)
        tv_w = jnp.sum(acc_w_ref[...], keepdims=True) / n_w
        out_ref[...] = ((tv_h + tv_w) / norm).astype(out_ref.dtype)


def variation_loss(image: jax.Array, k_size: int) -> jax.Array:
    """image: (B, C, H, W). Returns scalar f32 TV loss (matches the PyTorch module)."""
    b, c, h, w = image.shape
    if not (0 < k_size < h and k_size < w):
        raise ValueError("k_size must satisfy 0 < k_size < min(H, W)")

    n = b * c
    m = h * w
    mp = _round_up(m, 128)                        # lane-dense last dim

    # Flatten each (H, W) plane onto the lane axis; zero-pad lanes to 128x.
    x = image.reshape(n, m)
    if mp != m:
        x = jnp.pad(x, ((0, 0), (0, mp - m)))

    # Fuse B*C slices into ~2 MiB blocks (tn rows, multiple of 8, capped).
    itemsize = x.dtype.itemsize
    target_bytes = 2 * 1024 * 1024
    tn = max(8, (target_bytes // (mp * itemsize)) // 8 * 8)
    tn = min(tn, _round_up(n, 8), 512)
    n_pad = _round_up(n, tn)
    if n_pad != n:
        x = jnp.pad(x, ((0, n_pad - n), (0, 0)))  # zero rows contribute 0

    # 0/1 masks for valid difference positions (computed once, outside kernel).
    col = jnp.arange(mp, dtype=jnp.int32)
    mask_h = (col < (h - k_size) * w).astype(jnp.float32)[None, :]
    mask_w = (((col % w) < (w - k_size)) & (col < m)).astype(jnp.float32)[None, :]

    # We need rolled[i] = x[i + s]; pick the shift sign matching pltpu.roll.
    if _roll_matches_jnp():
        shift_h = (-(k_size * w)) % mp
        shift_w = (-k_size) % mp
    else:
        shift_h = (k_size * w) % mp
        shift_w = k_size % mp

    kernel = functools.partial(
        _tv_kernel,
        shift_h=int(shift_h),
        shift_w=int(shift_w),
        n_h=float(b * c * (h - k_size) * w),      # element count of tv_h mean
        n_w=float(b * c * h * (w - k_size)),      # element count of tv_w mean
        norm=float(3 * h * w),
    )

    grid = (n_pad // tn,)
    out = pl.pallas_call(
        kernel,
        out_shape=jax.ShapeDtypeStruct((1, 1), jnp.float32),
        grid_spec=pltpu.PrefetchScalarGridSpec(
            num_scalar_prefetch=0,
            grid=grid,
            in_specs=[
                pl.BlockSpec((1, mp), lambda i: (0, 0)),     # h-mask (fetched once)
                pl.BlockSpec((1, mp), lambda i: (0, 0)),     # w-mask (fetched once)
                pl.BlockSpec((tn, mp), lambda i: (i, 0)),    # image block
            ],
            out_specs=pl.BlockSpec((1, 1), lambda i: (0, 0)),
            scratch_shapes=[
                pltpu.VMEM((8, mp), jnp.float32),            # dh^2 partial sums
                pltpu.VMEM((8, mp), jnp.float32),            # dw^2 partial sums
            ],
        ),
        compiler_params=pltpu.CompilerParams(
            # Single reduction axis sharing the accumulators -> arbitrary.
            dimension_semantics=("arbitrary",),
            # Headroom for the 2 MiB double-buffered blocks + f32 temporaries;
            # safe on v5e/v6e (128 MiB) and v7x (64 MiB) physical VMEM.
            vmem_limit_bytes=48 * 1024 * 1024,
        ),
    )(mask_h, mask_w, x)
    return out[0, 0]


def variation_loss_ref(image: jax.Array, k_size: int) -> jax.Array:
    b, c, h, w = image.shape
    img = image.astype(jnp.float32)
    tv_h = jnp.mean((img[:, :, k_size:, :] - img[:, :, :-k_size, :]) ** 2)
    tv_w = jnp.mean((img[:, :, :, k_size:] - img[:, :, :, :-k_size]) ** 2)
    return (tv_h + tv_w) / (3.0 * h * w)


if __name__ == "__main__":
    key = jax.random.PRNGKey(0)
    b, c, h, w = 2, 4, 16, 16
    k_size = 1

    image = jax.random.normal(key, (b, c, h, w), dtype=jnp.float32)

    loss = jax.block_until_ready(variation_loss(image, k_size))
    ref = jax.block_until_ready(variation_loss_ref(image, k_size))
    assert jnp.allclose(loss, ref, rtol=1e-5, atol=1e-7), (loss, ref)

    print("KERNEL_OK")
</pallas_src>

<mosaic_0001>
module attributes {stable_mosaic.version = 11 : i64} {
  func.func @probe(%arg0: memref<8x128xf32, #tpu.memory_space<vmem>>, %arg1: memref<8x128xf32, #tpu.memory_space<vmem>>) attributes {dimension_semantics = [], scalar_prefetch = 0 : i64, scratch_operands = 0 : i64, tpu.core_type = #tpu.core_type<tc>} {
    %c0 = arith.constant 0 : index
    %c0_0 = arith.constant 0 : index
    %0 = vector.load %arg0[%c0, %c0_0] : memref<8x128xf32, #tpu.memory_space<vmem>>, vector<8x128xf32>
    %c1_i32 = arith.constant 1 : i32
    %1 = tpu.dynamic_rotate %0 by %c1_i32 dim 1 : vector<8x128xf32>, i32 -> vector<8x128xf32>
    %c0_1 = arith.constant 0 : index
    %c0_2 = arith.constant 0 : index
    %2 = vector.load %arg1[%c0_1, %c0_2] : memref<8x128xf32, #tpu.memory_space<vmem>>, vector<8x128xf32>
    tpu.vector_store %arg1[%c0_1, %c0_2], %1 {strides = array<i32>} : memref<8x128xf32, #tpu.memory_space<vmem>>, vector<8x128xf32>,
    return
  }
}

</mosaic_0001>

<bundles_post_ra>
// kernel: tpu_custom_call.1
= control target key start
LH: loop header
LB: loop body
LE: loop exit
PB: predicated region body
PF: predicated region fallthrough
CT: control target
= control target key end

     0   :  { %6 = vsyncpa [#allocation3], 0  ;;  %s106_s0 = inlined_call_operand.hbm [shape: f32[8,128], index: 0, kind: input, shape index: {}]   ;;  %s107_s1 = inlined_call_operand.hbm [shape: f32[8,128], index: 1, kind: output, shape index: {}]  }
   0x1   :  { %7 = vsyncpa [#allocation4], 0  ;;  %s87_s6 = smov [#allocation2]  }
   0x2   :  { %s14_s7 = sshll.u32 %s87_s6, 4  ;;  %s15_s7 = int_to_ptr.vmem [resolvable:$true] %s14_s7 }
   0x3   :  { %s51_s8 = scalar_lea.vmem %s15_s7, 128  ;;  %p56_p1 = scmp.lt.s32.totalorder %s15_s7, %s15_s7 }
   0x4   :  { %p52_p0 = scmp.ne.s32.totalorder %s15_s7, %s51_s8  ;;  %p57_p2 = scmp.lt.s32.totalorder %s51_s8, %s51_s8 }
   0x6   :  { %p58_p3 = por %p57_p2, %p56_p1 }
   0x8   :  { %p59_p4 = pnand %p58_p3, %p52_p0 }
   0xa   :  { %62 = shalt.err (!%p59_p4)
}
   0xb   :  { %17 = dma.hbm_to_vmem [thread:$0]  %s106_s0, 128, %s15_s7, [#allocation3]  }
   0xc   :  { %83 = dma.done.wait [#allocation3], 128  }
   0xd   :  { %84 = vsyncadd [#allocation3], 4294967168  ;;  %v21_v0 = vld [vmem:[#allocation2] sm:$0xff]  ;;  %s88_s11 = smov 1   ;;  %s89_s12 = smov [#allocation5]  }
   0xe   :  { %22 = vrot.lane.b32.xlu0 %v21_v0, %s88_s11  ;;  %s31_s13 = sshll.u32 %s89_s12, 4  ;;  %s32_s13 = int_to_ptr.vmem [resolvable:$true] %s31_s13 }
   0xf   :  { %s63_s14 = scalar_lea.vmem %s32_s13, 128  ;;  %p68_p6 = scmp.lt.s32.totalorder %s32_s13, %s32_s13 }
  0x10   :  { %p64_p5 = scmp.ne.s32.totalorder %s32_s13, %s63_s14  ;;  %p69_p7 = scmp.lt.s32.totalorder %s63_s14, %s63_s14 }
  0x12   :  { %p70_p8 = por %p69_p7, %p68_p6 }
  0x14   :  { %p71_p9 = pnand %p70_p8, %p64_p5 }
  0x80   :  { %v23_v1 = vpop.permute.xlu0 %22 }
  0x81   :  { %24 = vst [vmem:[#allocation5] sm:$0xff] %v23_v1 }
  0x82   :  { %74 = shalt.err (!%p71_p9)
}
  0x83   :  { %34 = dma.vmem_to_hbm [thread:$0]  %s32_s13, 128, %s107_s1, [#allocation4]  }
  0x84   :  { %85 = dma.done.wait [#allocation4], 128  }
  0x85   :  { %86 = vsyncadd [#allocation4], 4294967168 }
  0x86   :  { %38 = vsyncpa [#allocation3], 1 }
  0x87   :  { %39 = vsyncpa [#allocation4], 1 }

</bundles_post_ra>
